<compile_context>
chip_gen: v7x
topology: tpu7x:2x2x1
jax: 0.10.0
libtpu: 0.0.40
codegen_flags: <defaults>
</compile_context>

<pallas_src>
import jax
import jax.numpy as jnp
from jax.experimental import pallas as pl
from jax.experimental.pallas import tpu as pltpu

BN_EPS = 1e-5
_LANE = 128


def _round_up(v, m):
    return ((v + m - 1) // m) * m


def _tensorcores_per_chip():
    """>=2 grid steps only where one chip exposes 2 TensorCores (v7x / megacore parts)."""
    try:
        kind = jax.devices()[0].device_kind.lower()
    except Exception:
        return 1
    return 2 if any(t in kind for t in ("v7", "v5p", "v4", "v3")) else 1


# ----------------------------------------------------------------------------------------------
# Phase 1: channels-major bf16 conv on the MXU + per-channel sum / sum-of-squares (nothing else).
# ----------------------------------------------------------------------------------------------
def _conv_stats_kernel(w_ref, p_ref, stats_ref):
    """w_ref: (Cout, Kpad) bf16;  p_ref: (Kpad, L) bf16;  stats_ref: (1, Cout, 2) f32."""
    acc = jnp.dot(w_ref[...], p_ref[...], preferred_element_type=jnp.float32)   # (Cout, L) f32
    s = jnp.sum(acc, axis=1, keepdims=True)                                     # (Cout, 1)
    sq = jnp.sum(acc * acc, axis=1, keepdims=True)                              # (Cout, 1)
    stats_ref[0] = jnp.concatenate([s, sq], axis=1)                             # (Cout, 2)


# ----------------------------------------------------------------------------------------------
# Phase 2: recompute the conv (same bf16 weights) and fuse folded-BN scale/shift + ReLU.
# ----------------------------------------------------------------------------------------------
def _conv_bn_relu_kernel(w_ref, p_ref, scale_ref, shift_ref, out_ref):
    """All operands lane-dense; result stored channels-major (Cout, L) with no transpose."""
    acc = jnp.dot(w_ref[...], p_ref[...], preferred_element_type=jnp.float32)   # (Cout, L) f32
    out_ref[...] = jnp.maximum(acc * scale_ref[...] + shift_ref[...], 0.0)


def conv_bn_relu(x_nchw, w_hwio, bias, gamma, beta, kernel_size):
    """NCHW input (PyTorch convention) -> NCHW output.

    `bias` is accepted for interface parity but algebraically dropped: training-mode BN subtracts
    the batch mean, so the conv bias has no effect on the forward output.
    """
    del bias
    pad = (kernel_size - 1) // 2
    N, Cin, H, W = x_nchw.shape
    KH, KW, _, Cout = w_hwio.shape
    HW = H * W
    L_total = N * HW
    Kdim = KH * KW * Cin
    Kpad = _round_up(Kdim, 16)          # bf16 sublane packing granularity: 36 -> 48 (not 128)

    # -------- wrapper-side layout glue (one pass over the small bf16 input) -------------------
    # bf16 cast first, halo-pad in NCHW, then build the im2col patch with the contraction in
    # sublanes and the flattened (n, h, w) pixels in lanes.  Row order is (kh, kw, cin), matching
    # w_hwio.reshape(Kdim, Cout).
    # TODO(synk): for large H*W, tile spatially and form the halo inside the kernel
    # (memory_space=pl.ANY + manual DMA) instead of materializing the KH*KW-fold patch in HBM.
    x_bf = x_nchw.astype(jnp.bfloat16)
    xp = jnp.pad(x_bf, ((0, 0), (0, 0), (pad, pad), (pad, pad)))                # (N, Cin, Hp, Wp)
    rows = []
    for kh in range(KH):
        for kw in range(KW):
            sh = xp[:, :, kh:kh + H, kw:kw + W]                                 # (N, Cin, H, W)
            rows.append(jnp.transpose(sh, (1, 0, 2, 3)).reshape(Cin, L_total))
    patch = jnp.concatenate(rows, axis=0)                                       # (Kdim, N*HW) bf16
    patch = jnp.pad(patch, ((0, Kpad - Kdim), (0, 0)))

    w_mat = jnp.transpose(w_hwio.reshape(Kdim, Cout))                           # (Cout, Kdim)
    w_mat = jnp.pad(w_mat, ((0, 0), (0, Kpad - Kdim))).astype(jnp.bfloat16)     # (Cout, Kpad)

    # -------- grid: one lane-chunk of the flattened pixel axis per TensorCore ------------------
    n_tc = _tensorcores_per_chip()
    n_steps = n_tc if (n_tc > 1 and L_total % (n_tc * _LANE) == 0) else 1
    L = L_total // n_steps

    cparams = pltpu.CompilerParams(
        dimension_semantics=("parallel",),
        vmem_limit_bytes=32 * 1024 * 1024,      # working set is tiny; stays well under v7x 64 MiB
    )

    # -------- phase 1: per-channel sum / sum-of-squares ----------------------------------------
    stats = pl.pallas_call(
        _conv_stats_kernel,
        out_shape=jax.ShapeDtypeStruct((n_steps, Cout, 2), jnp.float32),
        grid=(n_steps,),
        in_specs=[
            pl.BlockSpec((Cout, Kpad), lambda n: (0, 0)),
            pl.BlockSpec((Kpad, L), lambda n: (0, n)),
        ],
        out_specs=pl.BlockSpec((1, Cout, 2), lambda n: (n, 0, 0)),
        compiler_params=cparams,
    )(w_mat, patch)

    # -------- finalize BN over the FULL (N, H, W) extent (O(Cout) glue) and fold the affine ----
    #   scale = gamma / sqrt(var + eps),   shift = beta - mean * scale
    m = float(L_total)
    totals = jnp.sum(stats, axis=0)                                  # (Cout, 2)
    mean = totals[:, 0] / m
    var = jnp.maximum(totals[:, 1] / m - mean * mean, 0.0)           # one-pass biased variance
    # TODO(synk): switch to shifted / two-pass accumulation if |mean| >> std on real data.
    scale = gamma.astype(jnp.float32) * jax.lax.rsqrt(var + BN_EPS)
    shift = beta.astype(jnp.float32) - mean * scale
    scale_b = jnp.broadcast_to(scale[:, None], (Cout, L_total))      # lane-dense epilogue operands
    shift_b = jnp.broadcast_to(shift[:, None], (Cout, L_total))

    # -------- phase 2: recompute conv + fused scale/shift/ReLU ---------------------------------
    out2d = pl.pallas_call(
        _conv_bn_relu_kernel,
        out_shape=jax.ShapeDtypeStruct((Cout, L_total), jnp.float32),
        grid=(n_steps,),
        in_specs=[
            pl.BlockSpec((Cout, Kpad), lambda n: (0, 0)),
            pl.BlockSpec((Kpad, L), lambda n: (0, n)),
            pl.BlockSpec((Cout, L), lambda n: (0, n)),
            pl.BlockSpec((Cout, L), lambda n: (0, n)),
        ],
        out_specs=pl.BlockSpec((Cout, L), lambda n: (0, n)),
        compiler_params=cparams,
    )(w_mat, patch, scale_b, shift_b)

    # (Cout, N*H*W) -> NCHW: tiny wrapper-side layout plumbing (16 KiB at test shapes).
    return jnp.transpose(out2d.reshape(Cout, N, H, W), (1, 0, 2, 3))


def reference(x_nchw, w_hwio, bias, gamma, beta, kernel_size):
    """Pure-JAX reference: conv (bf16 operands, f32 accumulation — matching the kernel's MXU
    quantization) + conv bias + training-mode BatchNorm (biased variance, eps=1e-5) + ReLU."""
    pad = (kernel_size - 1) // 2
    x_nhwc = jnp.transpose(x_nchw, (0, 2, 3, 1))
    y = jax.lax.conv_general_dilated(
        x_nhwc.astype(jnp.bfloat16), w_hwio.astype(jnp.bfloat16),
        window_strides=(1, 1), padding=[(pad, pad), (pad, pad)],
        dimension_numbers=("NHWC", "HWIO", "NHWC"),
        preferred_element_type=jnp.float32,
    ) + bias.reshape(1, 1, 1, -1).astype(jnp.float32)
    mean = jnp.mean(y, axis=(0, 1, 2), keepdims=True)
    var = jnp.mean((y - mean) ** 2, axis=(0, 1, 2), keepdims=True)
    y = (y - mean) * jax.lax.rsqrt(var + BN_EPS)
    y = y * gamma.reshape(1, 1, 1, -1) + beta.reshape(1, 1, 1, -1)
    y = jnp.maximum(y, 0.0)
    return jnp.transpose(y, (0, 3, 1, 2))


if __name__ == "__main__":
    # Small shapes consistent with the module: in_channels=4, out_channels=8, kernel_size=3.
    N, Cin, H, W = 2, 4, 16, 16
    Cout, K = 8, 3

    key = jax.random.PRNGKey(0)
    kx, kw, kb, kg, kbe = jax.random.split(key, 5)

    x = jax.random.normal(kx, (N, Cin, H, W), jnp.float32)           # NCHW input (PyTorch)
    w_hwio = jax.random.normal(kw, (K, K, Cin, Cout), jnp.float32) * 0.1
    bias = jax.random.normal(kb, (Cout,), jnp.float32) * 0.1
    gamma = 1.0 + 0.1 * jax.random.normal(kg, (Cout,), jnp.float32)  # BN weight
    beta = 0.1 * jax.random.normal(kbe, (Cout,), jnp.float32)        # BN bias

    out = conv_bn_relu(x, w_hwio, bias, gamma, beta, K)
    out = jax.block_until_ready(out)

    ref = reference(x, w_hwio, bias, gamma, beta, K)
    assert out.shape == (N, Cout, H, W)
    assert jnp.allclose(out, ref, atol=1e-3, rtol=1e-3), "mismatch vs reference"

    print("KERNEL_OK")
</pallas_src>

<mosaic_0001>
module attributes {stable_mosaic.version = 11 : i64} {
  func.func @_conv_stats_kernel(%arg0: i32, %arg1: memref<8x48xbf16, #tpu.memory_space<vmem>>, %arg2: memref<48x512xbf16, #tpu.memory_space<vmem>>, %arg3: memref<1x8x2xf32, #tpu.memory_space<vmem>>) attributes {dimension_semantics = [#tpu.dimension_semantics<parallel>], iteration_bounds = array<i64: 1>, scalar_prefetch = 0 : i64, scratch_operands = 0 : i64, tpu.core_type = #tpu.core_type<tc>, window_params = [{pipeline_mode = #tpu.pipeline_mode<synchronous>, transform_indices = @transform_0, window_bounds = array<i64: 8, 48>}, {transform_indices = @transform_1, window_bounds = array<i64: 48, 512>}, {transform_indices = @transform_2, window_bounds = array<i64: 1, 8, 2>}]} {
    %c0 = arith.constant 0 : index
    %c0_0 = arith.constant 0 : index
    %0 = vector.load %arg1[%c0, %c0_0] : memref<8x48xbf16, #tpu.memory_space<vmem>>, vector<8x48xbf16>
    %c0_1 = arith.constant 0 : index
    %c0_2 = arith.constant 0 : index
    %1 = vector.load %arg2[%c0_1, %c0_2] : memref<48x512xbf16, #tpu.memory_space<vmem>>, vector<48x512xbf16>
    %cst = arith.constant dense<0.000000e+00> : vector<8x512xf32>
    %2 = tpu.matmul %0, %1, %cst {dimension_numbers = #tpu.dot_dimension_numbers<[1], [0], [0], [1], [0, 0, 1, 1], [], []>} : vector<8x48xbf16>, vector<48x512xbf16>, vector<8x512xf32> -> vector<8x512xf32>
    %cst_3 = arith.constant dense<0.000000e+00> : vector<8xf32>
    %3 = vector.multi_reduction <add>, %2, %cst_3 [1] : vector<8x512xf32> to vector<8xf32>
    %4 = vector.shape_cast %3 : vector<8xf32> to vector<8x1xf32>
    %5 = arith.mulf %2, %2 : vector<8x512xf32>
    %cst_4 = arith.constant dense<0.000000e+00> : vector<8xf32>
    %6 = vector.multi_reduction <add>, %5, %cst_4 [1] : vector<8x512xf32> to vector<8xf32>
    %7 = vector.shape_cast %6 : vector<8xf32> to vector<8x1xf32>
    %8 = tpu.concatenate %4, %7 in 1 : vector<8x1xf32>, vector<8x1xf32> -> vector<8x2xf32>
    %c0_5 = arith.constant 0 : index
    %c0_6 = arith.constant 0 : index
    %c0_7 = arith.constant 0 : index
    %9 = vector.load %arg3[%c0_5, %c0_6, %c0_7] : memref<1x8x2xf32, #tpu.memory_space<vmem>>, vector<1x8x2xf32>
    %10 = vector.shape_cast %9 : vector<1x8x2xf32> to vector<8x2xf32>
    %11 = vector.shape_cast %8 : vector<8x2xf32> to vector<1x8x2xf32>
    tpu.vector_store %arg3[%c0_5, %c0_6, %c0_7], %11 {strides = array<i32>} : memref<1x8x2xf32, #tpu.memory_space<vmem>>, vector<1x8x2xf32>,
    return
  }
  func.func @transform_0(%arg0: i32) -> (i32, i32) {
    %c0_i32 = arith.constant 0 : i32
    %c0_i32_0 = arith.constant 0 : i32
    %c0_i32_1 = arith.constant 0 : i32
    return %c0_i32, %c0_i32_0 : i32, i32
  }
  func.func @transform_1(%arg0: i32) -> (i32, i32) {
    %c0_i32 = arith.constant 0 : i32
    %c0_i32_0 = arith.constant 0 : i32
    return %c0_i32, %arg0 : i32, i32
  }
  func.func @transform_2(%arg0: i32) -> (i32, i32, i32) {
    %c0_i32 = arith.constant 0 : i32
    %c0_i32_0 = arith.constant 0 : i32
    %c0_i32_1 = arith.constant 0 : i32
    return %arg0, %c0_i32, %c0_i32_0 : i32, i32, i32
  }
}

</mosaic_0001>

<bundles_post_ra>
// kernel: tpu_custom_call.1
= control target key start
LH: loop header
LB: loop body
LE: loop exit
PB: predicated region body
PF: predicated region fallthrough
CT: control target
= control target key end

     0   :  { %7 = vsyncpa [#allocation3], 0  ;;  %s360_s0 = inlined_call_operand.hbm [shape: bf16[8,48], index: 0, kind: input, shape index: {}]   ;;  %s361_s1 = inlined_call_operand.hbm [shape: bf16[48,512], index: 1, kind: input, shape index: {}]   ;;  %s362_s2 = inlined_call_operand.vmem [shape: f32[1,8,2], index: 2, kind: output, shape index: {}]  }
   0x1   :  { %8 = vsyncpa [#allocation5], 0  ;;  %s306_s9 = smov [#allocation2]   ;;  %s307_s11 = smov [#allocation4]  }
   0x2   :  { %s15_s10 = sshll.u32 %s306_s9, 4  ;;  %s24_s12 = sshll.u32 %s307_s11, 4  ;;  %s16_s10 = int_to_ptr.vmem [resolvable:$true] %s15_s10  ;;  %s326_s12 = int_to_ptr.vmem [resolvable:$true] %s24_s12 }
   0x3   :  { %s258_s15 = scalar_lea.hbm %s360_s0, 64 }
   0x4   :  { %p259_p0 = scmp.ne.s32.totalorder %s360_s0, %s258_s15  ;;  %p262_p1 = scmp.lt.u32.totalorder %s258_s15, %s360_s0 }
   0x6   :  { %p264_p2 = pnand %p262_p1, %p259_p0 }
   0x8   :  { %267 = shalt.err (!%p264_p2)
}
   0x9   :  { %s268_s20 = scalar_lea.vmem %s16_s10, 64  ;;  %p273_p4 = scmp.lt.s32.totalorder %s16_s10, %s16_s10 }
   0xa   :  { %p269_p3 = scmp.ne.s32.totalorder %s16_s10, %s268_s20  ;;  %p274_p5 = scmp.lt.s32.totalorder %s268_s20, %s268_s20 }
   0xc   :  { %p275_p6 = por %p274_p5, %p273_p4 }
   0xe   :  { %p276_p7 = pnand %p275_p6, %p269_p3 }
  0x10   :  { %279 = shalt.err (!%p276_p7)
}
  0x11   :  { %18 = dma.hbm_to_vmem [thread:$0]  %s360_s0, 64, %s16_s10, [#allocation3]  }
  0x12   :  { %s280_s25 = scalar_lea.hbm %s361_s1, 1536 }
  0x13   :  { %p281_p8 = scmp.ne.s32.totalorder %s361_s1, %s280_s25  ;;  %p284_p9 = scmp.lt.u32.totalorder %s280_s25, %s361_s1 }
  0x15   :  { %p286_p10 = pnand %p284_p9, %p281_p8 }
  0x17   :  { %289 = shalt.err (!%p286_p10)
}
  0x18   :  { %s290_s30 = scalar_lea.vmem %s326_s12, 1536  ;;  %p295_p12 = scmp.lt.s32.totalorder %s326_s12, %s326_s12 }
  0x19   :  { %p291_p11 = scmp.ne.s32.totalorder %s326_s12, %s290_s30  ;;  %p296_p13 = scmp.lt.s32.totalorder %s290_s30, %s290_s30 }
  0x1b   :  { %p297_p0 = por %p296_p13, %p295_p12 }
  0x1d   :  { %p298_p1 = pnand %p297_p0, %p291_p11 }
  0x1f   :  { %301 = shalt.err (!%p298_p1)
}
  0x20   :  { %s308_s0 = smov 256   ;;  %s309_s3 = smov 16  }
  0x21   :  { %30 = dma.hbm_to_vmem [thread:$0]  %s361_s1, 1536, %s326_s12, [#allocation5], %s308_s0, %s308_s0, %s309_s3  }
  0x22   :  { %302 = dma.done.wait [#allocation3], 64  }
  0x23   :  { %303 = vsyncadd [#allocation3], 4294967232 }
  0x24   :  { %304 = dma.done.wait [#allocation5], 1536  }
  0x25   :  { %305 = vsyncadd [#allocation5], 4294965760  ;;  %v310_v0 = vmov 0   ;;  %v240_v1 = vld [vmem:[#allocation4 + $0x4] ss:$16 sps:$4 sm:$0xff]   ;;  %vm111_vm0 = vcmask 392192  }
  0x26   :  { %147 = vmatprep.mubr.bf16.mxu0 %v310_v0  ;;  %188 = vmatprep.mubr.bf16.mxu1 %v310_v0  ;;  %v242_v2 = vld [vmem:[#allocation4 + $0xc] ss:$16 sps:$4 sm:$0xff]   ;;  %v244_v3 = vld [vmem:[#allocation4] ss:$16 sps:$4 sm:$0xff]   ;;  %v245_v4 = vld [vmem:[#allocation4 + $0x8] ss:$16 sps:$4 sm:$0xff]  }
  0x27   :  { %115 = vmatprep.subr.bf16.mxu0 %v240_v1  ;;  %156 = vmatprep.subr.bf16.mxu1 %v242_v2  ;;  %v246_v5 = vld [vmem:[#allocation4 + $0x24] ss:$16 sps:$4 sm:$0xff]   ;;  %v248_v6 = vld [vmem:[#allocation4 + $0x2c] ss:$16 sps:$4 sm:$0xff]   ;;  %v250_v7 = vld [vmem:[#allocation4 + $0x20] ss:$16 sps:$4 sm:$0xff]  }
  0x28   :  { %116 = vmatpush1.bf16.msra.mxu0 %v244_v3  ;;  %157 = vmatpush1.bf16.msra.mxu1 %v245_v4  ;;  %v251_v8 = vld [vmem:[#allocation4 + $0x28] ss:$16 sps:$4 sm:$0xff]   ;;  %v252_v9 = vld [vmem:[#allocation4 + $0x44] ss:$16 sps:$4 sm:$0xff]   ;;  %v254_v10 = vld [vmem:[#allocation4 + $0x4c] ss:$16 sps:$4 sm:$0xff]  }
  0x29   :  { %117 = vmatprep.subr.bf16.mxu0 %v246_v5  ;;  %158 = vmatprep.subr.bf16.mxu1 %v248_v6  ;;  %v256_v11 = vld [vmem:[#allocation4 + $0x40] ss:$16 sps:$4 sm:$0xff]   ;;  %v257_v12 = vld [vmem:[#allocation4 + $0x48] ss:$16 sps:$4 sm:$0xff]   ;;  %v38_v13 = vld [vmem:[#allocation2] sm:$0xf] }
  0x2a   :  { %vm211_vm1 = vcmask 7168   ;;  %vm213_vm2 = vcmask 15360  }
  0x2c   :  { %118 = vmatpush1.bf16.msra.mxu0 %v250_v7  ;;  %159 = vmatpush1.bf16.msra.mxu1 %v251_v8 }
  0x2d   :  { %119 = vmatprep.subr.bf16.mxu0 %v252_v9  ;;  %160 = vmatprep.subr.bf16.mxu1 %v254_v10 }
  0x30   :  { %120 = vmatpush1.bf16.msra.mxu0 %v256_v11  ;;  %161 = vmatpush1.bf16.msra.mxu1 %v257_v12 }
  0x33   :  { %233 = vmatmul.mubr.msk.bf16.vlgmr.msra.gmra.mrb[0].mxu0 %vm111_vm0, %v38_v13  ;;  %234 = vmatmul.mubr.msk.bf16.vlgmr.msra.gmra.mrb[0].mxu1 %vm111_vm0, %v38_v13 }
 0x106   :  { %v149_v14 = vpop.f32.mrb[0].mxu0  ;;  %v190_v15 = vpop.f32.mrb[0].mxu1 }
 0x107   :  { %v202_v16 = vmul.f32 %v149_v14, %v149_v14  ;;  %v151_v17 = vpop.f32.mrb[1].mxu0  ;;  %v192_v18 = vpop.f32.mrb[1].mxu1  ;;  %v204_v19 = vmul.f32 %v190_v15, %v190_v15 }
 0x108   :  { %v197_v20 = vadd.f32 %v151_v17, %v149_v14  ;;  %v203_v21 = vmul.f32 %v151_v17, %v151_v17  ;;  %v153_v22 = vpop.f32.mrb[2].mxu0  ;;  %v194_v23 = vpop.f32.mrb[2].mxu1  ;;  %v205_v28 = vmul.f32 %v192_v18, %v192_v18 }
 0x109   :  { %v154_v24 = vpop.f32.mrb[3].mxu0  ;;  %v195_v25 = vpop.f32.mrb[3].mxu1 }
 0x10a   :  { %v206_v26 = vadd.f32 %v203_v21, %v202_v16  ;;  %v198_v27 = vadd.f32 %v197_v20, %v190_v15 }
 0x10c   :  { %v199_v29 = vadd.f32 %v198_v27, %v192_v18  ;;  %v207_v30 = vadd.f32 %v206_v26, %v204_v19 }
 0x10e   :  { %200 = vadd.xlane.f32.xlu0 %v199_v29  ;;  %v208_v31 = vadd.f32 %v207_v30, %v205_v28 }
 0x112   :  { %209 = vadd.xlane.f32.xlu0 %v208_v31 }
 0x19b   :  { %v201_v32 = vpop.xlane.xlu0 %200 }
 0x19f   :  { %v210_v33 = vpop.xlane.xlu0 %209 }
 0x1a0   :  { %v212_v34 = vsel %vm211_vm1, %v201_v32, %v210_v33 }
 0x1a1   :  { %214 = vst.msk [vmem:[%s362_s2] sm:$0xff] %vm213_vm2, %v212_v34 }
 0x1a2   :  { %219 = vsyncpa [#allocation3], 1 }
 0x1a3   :  { %220 = vsyncpa [#allocation5], 1 }

</bundles_post_ra>
